<compile_context>
chip_gen: v7x
topology: tpu7x:2x2x1
jax: 0.10.0
libtpu: 0.0.40
codegen_flags: <defaults>
</compile_context>

<pallas_src>
import jax
import jax.numpy as jnp
import numpy as np
from jax.experimental import pallas as pl
from jax.experimental.pallas import tpu as pltpu


def _round_up(n, m):
    return ((n + m - 1) // m) * m


def _plan_packing(D, L, max_dp=512):
    """Largest P with L % P == 0, (P*D) % 128 == 0, P*D <= max_dp (else P = 1)."""
    best = 1
    for p in range(1, L + 1):
        if p * D > max_dp:
            break
        if L % p == 0 and (p * D) % 128 == 0:
            best = p
    return best


def _block_diag(w, p):
    """block_diag(w, ..., w) with p copies (built once, outside the hot path)."""
    if p == 1:
        return w
    return jnp.kron(jnp.eye(p, dtype=w.dtype), w)


def _pick_tiles(B, Lp, bytes_per_row, budget_bytes, min_steps=2):
    """Pick (TB, TLp) dividing (B, Lp): biggest block within budget, >= min_steps grid
    steps when possible, and a sublane-friendly (8-aligned or full) sequence tile."""

    def divisors(n):
        return [d for d in range(1, n + 1) if n % d == 0]

    tl_opts = [d for d in divisors(Lp) if d == Lp or d % 8 == 0]
    cands = []
    for tb in divisors(B):
        for tl in tl_opts:
            if tb * tl * bytes_per_row > budget_bytes:
                continue
            steps = (B // tb) * (Lp // tl)
            cands.append((tb, tl, steps))
    if not cands:
        return 1, min(tl_opts)
    good = [c for c in cands if c[2] >= min_steps] or cands
    tb, tl, _ = max(good, key=lambda c: (c[0] * c[1], c[1]))
    return tb, tl


def _denoiser_kernel(x_ref, blend_ref, w1_ref, b1_ref, w2_ref, b2_ref, o_ref):
    # Per-grid-step views (packed layout, Dpad = lane-padded P*D, N1 = padded P*D//2):
    #   x_ref     : (TB, TLp, Dpad)     blend_ref : (TB, 1, Dpad)  (= 0.2*te*ce, packed)
    #   w1_ref    : (Dpad, N1)          b1_ref    : (1, N1)   f32
    #   w2_ref    : (N1, Dpad)          b2_ref    : (1, Dpad) f32
    #   o_ref     : (TB, TLp, Dpad)
    tb, tlp, dpad = x_ref.shape
    rows = tb * tlp

    # Blend in the compute dtype (one FMA; broadcast over the sequence-tile dim).
    h = blend_ref[...] + 0.8 * x_ref[...]                      # (TB, TLp, Dpad)
    h2 = h.reshape(rows, dpad)                                 # leading-dim merge: layout-safe

    # encoder: Linear(D -> D//2) + ReLU (block-diag packed), f32 accumulation.
    z = jnp.dot(h2, w1_ref[...], preferred_element_type=jnp.float32) + b1_ref[...]
    z = jnp.maximum(z, 0.0)

    # decoder: Linear(D//2 -> D) + Sigmoid (block-diag packed).
    y = jnp.dot(z.astype(w2_ref.dtype), w2_ref[...],
                preferred_element_type=jnp.float32) + b2_ref[...]
    y = jax.nn.sigmoid(y)

    o_ref[...] = y.reshape(tb, tlp, dpad).astype(o_ref.dtype)


def make_denoiser(w1, b1, w2, b2, seq_len, compute_dtype=jnp.bfloat16):
    """Pack weights once and return a jitted forward(x, time_emb, condition_emb).

    compute_dtype=jnp.bfloat16 (default) halves HBM traffic (output is bf16; f32
    accumulation inside).  compute_dtype=jnp.float32 reproduces PyTorch numerics.
    """
    D, D2 = int(w1.shape[0]), int(w1.shape[1])
    L = int(seq_len)
    cd = jnp.dtype(compute_dtype)
    itemsize = cd.itemsize

    # Lane packing: fold P sequence positions into one (up to 512-wide) lane row.
    P = _plan_packing(D, L)
    Lp = L // P
    Dp = P * D
    Dpad = _round_up(Dp, 128)          # pad when D does not divide 128 (P == 1 case)
    N1 = P * D2
    N1pad = _round_up(N1, 128)

    # --- Packed parameters, built ONCE (hoisted out of the per-call path). ---------
    w1_f32 = jnp.asarray(w1, jnp.float32)
    w2_f32 = jnp.asarray(w2, jnp.float32)
    w1p = jnp.pad(_block_diag(w1_f32, P), ((0, Dpad - Dp), (0, N1pad - N1))).astype(cd)
    w2p = jnp.pad(_block_diag(w2_f32, P), ((0, N1pad - N1), (0, Dpad - Dp))).astype(cd)
    b1p = jnp.pad(jnp.tile(jnp.asarray(b1, jnp.float32).reshape(-1), (P,)),
                  (0, N1pad - N1)).reshape(1, N1pad)
    b2p = jnp.pad(jnp.tile(jnp.asarray(b2, jnp.float32).reshape(-1), (P,)),
                  (0, Dpad - Dp)).reshape(1, Dpad)

    # --- VMEM budgeting (v7x has 64 MiB physical VMEM; v5e/v6e have 128 MiB). ------
    try:
        vmem_cap = int(pltpu.get_tpu_info().vmem_capacity_bytes)
    except Exception:
        vmem_cap = 64 * 1024 * 1024                     # conservative: v7x per-core
    block_budget = max(512 * 1024, min(4 * 1024 * 1024, vmem_cap // 24))

    @jax.jit
    def forward(x, time_emb, condition_emb):
        B, Lx, Dx = x.shape
        assert Lx == L and Dx == D, "input shape does not match make_denoiser config"

        # One small blend stream instead of two embedding streams + in-kernel mul.
        blend = 0.2 * (time_emb.astype(jnp.float32) * condition_emb.astype(jnp.float32))
        blend = jnp.tile(blend, (1, 1, P)).astype(cd)            # (B, 1, Dp)
        if Dpad > Dp:
            blend = jnp.pad(blend, ((0, 0), (0, 0), (0, Dpad - Dp)))

        xs = x.astype(cd).reshape(B, Lp, Dp)                      # row-major lane packing
        if Dpad > Dp:
            xs = jnp.pad(xs, ((0, 0), (0, 0), (0, Dpad - Dp)))

        TB, TLp = _pick_tiles(B, Lp, Dpad * itemsize, block_budget)
        grid = (B // TB, Lp // TLp)

        # Explicit scoped-VMEM limit from the real per-step footprint:
        # double-buffered x/out blocks, double-buffered small operands, and the
        # in-kernel h / z / y temporaries.
        block_bytes = TB * TLp * Dpad * itemsize
        rows = TB * TLp
        vmem_need = (4 * block_bytes                              # x + out, double-buffered
                     + 2 * TB * Dpad * itemsize                   # blend block, double-buffered
                     + 2 * (2 * Dpad * N1pad * itemsize + (N1pad + Dpad) * 4)  # weights+biases
                     + block_bytes                                # h (compute dtype)
                     + rows * (N1pad + Dpad) * 4)                 # z + y in f32
        vmem_limit = int(min(max(2 * vmem_need, 32 * 1024 * 1024), 48 * 1024 * 1024))

        total_rows = B * Lp
        cost = pl.CostEstimate(
            flops=int(4 * total_rows * Dpad * N1pad + 4 * total_rows * Dpad),
            transcendentals=int(total_rows * Dpad),
            bytes_accessed=int(2 * total_rows * Dpad * itemsize   # x in + out
                               + B * Dpad * itemsize              # blend
                               + 2 * Dpad * N1pad * itemsize      # packed weights
                               + (N1pad + Dpad) * 4),             # f32 biases
        )

        # Donate xs to the output when xs is guaranteed to be a fresh buffer
        # (cast and/or pad happened); shapes and dtypes match exactly.
        aliases = {0: 0} if (cd != x.dtype or Dpad > Dp) else {}

        out = pl.pallas_call(
            _denoiser_kernel,
            out_shape=jax.ShapeDtypeStruct((B, Lp, Dpad), cd),
            grid_spec=pltpu.PrefetchScalarGridSpec(
                num_scalar_prefetch=0,
                grid=grid,
                in_specs=[
                    pl.BlockSpec((TB, TLp, Dpad), lambda i, j: (i, j, 0)),  # x (packed)
                    pl.BlockSpec((TB, 1, Dpad), lambda i, j: (i, 0, 0)),    # blend
                    pl.BlockSpec((Dpad, N1pad), lambda i, j: (0, 0)),       # W1 (packed)
                    pl.BlockSpec((1, N1pad), lambda i, j: (0, 0)),          # b1
                    pl.BlockSpec((N1pad, Dpad), lambda i, j: (0, 0)),       # W2 (packed)
                    pl.BlockSpec((1, Dpad), lambda i, j: (0, 0)),           # b2
                ],
                out_specs=pl.BlockSpec((TB, TLp, Dpad), lambda i, j: (i, j, 0)),
            ),
            compiler_params=pltpu.CompilerParams(
                dimension_semantics=("parallel", "parallel"),
                vmem_limit_bytes=vmem_limit,
            ),
            cost_estimate=cost,
            input_output_aliases=aliases,
        )(xs, blend, w1p, b1p, w2p, b2p)

        if Dpad > Dp:
            out = out[..., :Dp]
        return out.reshape(B, L, D)

    return forward


def denoiser_forward(x, time_emb, condition_emb, w1, b1, w2, b2,
                     compute_dtype=jnp.bfloat16):
    """One-shot convenience wrapper (prefer make_denoiser to hoist weight packing)."""
    fwd = make_denoiser(w1, b1, w2, b2, x.shape[1], compute_dtype=compute_dtype)
    return fwd(x, time_emb, condition_emb)


def reference_forward(x, time_emb, condition_emb, w1, b1, w2, b2):
    B, L, D = x.shape
    h = jnp.tile(time_emb * condition_emb, (1, L, 1))
    h = 0.2 * h + 0.8 * x
    h = jax.nn.relu(h @ w1 + b1)
    h = jax.nn.sigmoid(h @ w2 + b2)
    return h.reshape(B, -1, D)


if __name__ == "__main__":
    # Small, module-consistent shapes.
    B, L, D = 2, 8, 32
    D2 = D // 2

    key = jax.random.PRNGKey(0)
    kx, kt, kc, kw1, kb1, kw2, kb2 = jax.random.split(key, 7)

    x = jax.random.normal(kx, (B, L, D), dtype=jnp.float32)
    time_emb = jax.random.normal(kt, (B, 1, D), dtype=jnp.float32)
    condition_emb = jax.random.normal(kc, (B, 1, D), dtype=jnp.float32)

    # Deterministic parameter init (stored as (in, out), i.e. PyTorch W.T).
    w1 = jax.random.normal(kw1, (D, D2), dtype=jnp.float32) * (1.0 / np.sqrt(D))
    b1 = jax.random.normal(kb1, (D2,), dtype=jnp.float32) * 0.01
    w2 = jax.random.normal(kw2, (D2, D), dtype=jnp.float32) * (1.0 / np.sqrt(D2))
    b2 = jax.random.normal(kb2, (D,), dtype=jnp.float32) * 0.01

    # TODO(synk): self.layer_norm1 is defined in __init__ but unused in forward; omitted.

    ref = reference_forward(x, time_emb, condition_emb, w1, b1, w2, b2)

    # Exact (f32) path: matches the PyTorch module's numerics.
    fwd_f32 = make_denoiser(w1, b1, w2, b2, L, compute_dtype=jnp.float32)
    out_f32 = jax.block_until_ready(fwd_f32(x, time_emb, condition_emb))
    np.testing.assert_allclose(np.asarray(out_f32), np.asarray(ref),
                               rtol=1e-4, atol=1e-4)

    # Default bf16-I/O path (halves HBM traffic; f32 accumulation inside).
    fwd_bf16 = make_denoiser(w1, b1, w2, b2, L)          # compute_dtype=bf16 default
    out_bf16 = jax.block_until_ready(fwd_bf16(x, time_emb, condition_emb))
    np.testing.assert_allclose(np.asarray(out_bf16.astype(jnp.float32)),
                               np.asarray(ref), rtol=5e-2, atol=5e-2)

    print("KERNEL_OK")
</pallas_src>

<mosaic_0001>
module attributes {stable_mosaic.version = 11 : i64} {
  func.func @_denoiser_kernel(%arg0: i32, %arg1: i32, %arg2: memref<1x1x256xf32, #tpu.memory_space<vmem>>, %arg3: memref<1x1x256xf32, #tpu.memory_space<vmem>>, %arg4: memref<256x128xf32, #tpu.memory_space<vmem>>, %arg5: memref<1x128xf32, #tpu.memory_space<vmem>>, %arg6: memref<128x256xf32, #tpu.memory_space<vmem>>, %arg7: memref<1x256xf32, #tpu.memory_space<vmem>>, %arg8: memref<1x1x256xf32, #tpu.memory_space<vmem>>) attributes {dimension_semantics = [#tpu.dimension_semantics<parallel>, #tpu.dimension_semantics<parallel>], iteration_bounds = array<i64: 2, 1>, scalar_prefetch = 0 : i64, scratch_operands = 0 : i64, tpu.core_type = #tpu.core_type<tc>, window_params = [{transform_indices = @transform_0, window_bounds = array<i64: 1, 1, 256>}, {transform_indices = @transform_1, window_bounds = array<i64: 1, 1, 256>}, {pipeline_mode = #tpu.pipeline_mode<synchronous>, transform_indices = @transform_2, window_bounds = array<i64: 256, 128>}, {pipeline_mode = #tpu.pipeline_mode<synchronous>, transform_indices = @transform_3, window_bounds = array<i64: 1, 128>}, {pipeline_mode = #tpu.pipeline_mode<synchronous>, transform_indices = @transform_4, window_bounds = array<i64: 128, 256>}, {pipeline_mode = #tpu.pipeline_mode<synchronous>, transform_indices = @transform_5, window_bounds = array<i64: 1, 256>}, {transform_indices = @transform_6, window_bounds = array<i64: 1, 1, 256>}]} {
    %c0 = arith.constant 0 : index
    %c0_0 = arith.constant 0 : index
    %c0_1 = arith.constant 0 : index
    %0 = vector.load %arg3[%c0, %c0_0, %c0_1] : memref<1x1x256xf32, #tpu.memory_space<vmem>>, vector<1x1x256xf32>
    %c0_2 = arith.constant 0 : index
    %c0_3 = arith.constant 0 : index
    %c0_4 = arith.constant 0 : index
    %1 = vector.load %arg2[%c0_2, %c0_3, %c0_4] : memref<1x1x256xf32, #tpu.memory_space<vmem>>, vector<1x1x256xf32>
    %cst = arith.constant 8.000000e-01 : f32
    %2 = vector.broadcast %cst : f32 to vector<1x1x256xf32>
    %3 = arith.mulf %2, %1 : vector<1x1x256xf32>
    %4 = arith.addf %0, %3 : vector<1x1x256xf32>
    %5 = vector.shape_cast %4 : vector<1x1x256xf32> to vector<1x256xf32>
    %c0_5 = arith.constant 0 : index
    %c0_6 = arith.constant 0 : index
    %6 = vector.load %arg4[%c0_5, %c0_6] : memref<256x128xf32, #tpu.memory_space<vmem>>, vector<256x128xf32>
    %cst_7 = arith.constant dense<0.000000e+00> : vector<1x128xf32>
    %7 = tpu.matmul %5, %6, %cst_7 {dimension_numbers = #tpu.dot_dimension_numbers<[1], [0], [0], [1], [0, 0, 1, 1], [], []>} : vector<1x256xf32>, vector<256x128xf32>, vector<1x128xf32> -> vector<1x128xf32>
    %c0_8 = arith.constant 0 : index
    %c0_9 = arith.constant 0 : index
    %8 = vector.load %arg5[%c0_8, %c0_9] : memref<1x128xf32, #tpu.memory_space<vmem>>, vector<1x128xf32>
    %9 = arith.addf %7, %8 : vector<1x128xf32>
    %cst_10 = arith.constant 0.000000e+00 : f32
    %10 = vector.broadcast %cst_10 : f32 to vector<1x128xf32>
    %11 = arith.maximumf %9, %10 : vector<1x128xf32>
    %c0_11 = arith.constant 0 : index
    %c0_12 = arith.constant 0 : index
    %12 = vector.load %arg6[%c0_11, %c0_12] : memref<128x256xf32, #tpu.memory_space<vmem>>, vector<128x256xf32>
    %cst_13 = arith.constant dense<0.000000e+00> : vector<1x256xf32>
    %13 = tpu.matmul %11, %12, %cst_13 {dimension_numbers = #tpu.dot_dimension_numbers<[1], [0], [0], [1], [0, 0, 1, 1], [], []>} : vector<1x128xf32>, vector<128x256xf32>, vector<1x256xf32> -> vector<1x256xf32>
    %c0_14 = arith.constant 0 : index
    %c0_15 = arith.constant 0 : index
    %14 = vector.load %arg7[%c0_14, %c0_15] : memref<1x256xf32, #tpu.memory_space<vmem>>, vector<1x256xf32>
    %15 = arith.addf %13, %14 : vector<1x256xf32>
    %16 = arith.negf %15 : vector<1x256xf32>
    %17 = math.exp %16 : vector<1x256xf32>
    %cst_16 = arith.constant 1.000000e+00 : f32
    %18 = vector.broadcast %cst_16 : f32 to vector<1x256xf32>
    %19 = arith.addf %18, %17 : vector<1x256xf32>
    %20 = arith.divf %18, %19 : vector<1x256xf32>
    %21 = vector.shape_cast %20 : vector<1x256xf32> to vector<1x1x256xf32>
    %c0_17 = arith.constant 0 : index
    %c0_18 = arith.constant 0 : index
    %c0_19 = arith.constant 0 : index
    %22 = vector.load %arg8[%c0_17, %c0_18, %c0_19] : memref<1x1x256xf32, #tpu.memory_space<vmem>>, vector<1x1x256xf32>
    tpu.vector_store %arg8[%c0_17, %c0_18, %c0_19], %21 {strides = array<i32>} : memref<1x1x256xf32, #tpu.memory_space<vmem>>, vector<1x1x256xf32>,
    return
  }
  func.func @transform_0(%arg0: i32, %arg1: i32) -> (i32, i32, i32) {
    %c0_i32 = arith.constant 0 : i32
    %c0_i32_0 = arith.constant 0 : i32
    return %arg0, %arg1, %c0_i32 : i32, i32, i32
  }
  func.func @transform_1(%arg0: i32, %arg1: i32) -> (i32, i32, i32) {
    %c0_i32 = arith.constant 0 : i32
    %c0_i32_0 = arith.constant 0 : i32
    %c0_i32_1 = arith.constant 0 : i32
    return %arg0, %c0_i32, %c0_i32_0 : i32, i32, i32
  }
  func.func @transform_2(%arg0: i32, %arg1: i32) -> (i32, i32) {
    %c0_i32 = arith.constant 0 : i32
    %c0_i32_0 = arith.constant 0 : i32
    %c0_i32_1 = arith.constant 0 : i32
    return %c0_i32, %c0_i32_0 : i32, i32
  }
  func.func @transform_3(%arg0: i32, %arg1: i32) -> (i32, i32) {
    %c0_i32 = arith.constant 0 : i32
    %c0_i32_0 = arith.constant 0 : i32
    %c0_i32_1 = arith.constant 0 : i32
    return %c0_i32, %c0_i32_0 : i32, i32
  }
  func.func @transform_4(%arg0: i32, %arg1: i32) -> (i32, i32) {
    %c0_i32 = arith.constant 0 : i32
    %c0_i32_0 = arith.constant 0 : i32
    %c0_i32_1 = arith.constant 0 : i32
    return %c0_i32, %c0_i32_0 : i32, i32
  }
  func.func @transform_5(%arg0: i32, %arg1: i32) -> (i32, i32) {
    %c0_i32 = arith.constant 0 : i32
    %c0_i32_0 = arith.constant 0 : i32
    %c0_i32_1 = arith.constant 0 : i32
    return %c0_i32, %c0_i32_0 : i32, i32
  }
  func.func @transform_6(%arg0: i32, %arg1: i32) -> (i32, i32, i32) {
    %c0_i32 = arith.constant 0 : i32
    %c0_i32_0 = arith.constant 0 : i32
    return %arg0, %arg1, %c0_i32 : i32, i32, i32
  }
}

</mosaic_0001>

<bundles_post_ra>
// kernel: forward.1
= control target key start
LH: loop header
LB: loop body
LE: loop exit
PB: predicated region body
PF: predicated region fallthrough
CT: control target
= control target key end

     0   :  { %11 = vsyncpa [#allocation3], 0  ;;  %s1164_s0 = inlined_call_operand.vmem [shape: f32[2,1,256], index: 0, kind: input, shape index: {}]   ;;  %s1165_s1 = inlined_call_operand.vmem [shape: f32[2,1,256], index: 1, kind: input, shape index: {}]   ;;  %s1166_s2 = inlined_call_operand.hbm [shape: f32[256,128], index: 2, kind: input, shape index: {}]   ;;  %s1167_s3 = inlined_call_operand.vmem [shape: f32[1,128], index: 3, kind: input, shape index: {}]   ;;  %s1168_s4 = inlined_call_operand.hbm [shape: f32[128,256], index: 4, kind: input, shape index: {}]   ;;  %s1169_s5 = inlined_call_operand.vmem [shape: f32[1,256], index: 5, kind: input, shape index: {}]   ;;  %s1170_s6 = inlined_call_operand.vmem [shape: f32[2,1,256], index: 6, kind: output, shape index: {}]  }
   0x1   :  { %12 = vsyncpa [#allocation5], 0  ;;  %s1022_s21 = smov 0   ;;  %s1024_s22 = smov 0  }
   0x2   :  { %s1026_s23 = smov 0  }
   0x3 LB: > { %s717_s24 = sadd.s32 4294967295, %s977_s23   ;;  %s30_s25 = sadd.s32 1, %s973_s22  ;;  %s977_s23 = sphi %s1026_s23, %s18_s23   ;;  %s973_s22 = sphi %s1024_s22, %s1180_s22   ;;  %s969_s21 = sphi %s1022_s21, %s1179_s21  }
   0x4   : > { %p32_p0 = scmp.ge.s32.totalorder %s30_s25, 2  ;;  %p719_p1 = scmp.ge.s32.totalorder %s977_s23, 1 }
   0x5   : > { %p201_p2 = scmp.lt.s32.totalorder %s977_s23, 3  ;;  %p1047_p4 = scmp.eq.s32.totalorder %s717_s24, 0 }
   0x6   : > { %s1182_s25 = smov (%p32_p0, %s30_s25), 0  ;;  %s979_s28 = smov [#allocation2]  }
   0x7   : > { %p1043_p3 = pnand %p719_p1, %p201_p2  ;;  %s213_s29 = sshll.u32 %s979_s28, 4  ;;  %s214_s29 = int_to_ptr.vmem [resolvable:$true] %s213_s29 }
   0x8   : > { %s1175_s27 = scalar_select %p1047_p4, 1, 0 }
   0x9   : > { %s1174_s26 = scalar_select %p1043_p3, 1, 0 }
   0xa   : > { %p840_p5 = pneg %p1043_p3  ;;  %s980_s7 = smov [#allocation4]  }
   0xb   : > { %s229_s8 = sshll.u32 %s980_s7, 4  ;;  %s891_s11 = scalar_lea.hbm %s1166_s2, 4096  ;;  %s1059_s8 = int_to_ptr.vmem [resolvable:$true] %s229_s8 }
   0xc   : > { %p1055_p6 = pnand %p1047_p4, %p840_p5  ;;  %p892_p7 = scmp.ne.s32.totalorder %s1166_s2, %s891_s11 }
   0xd   : > { %p898_p11 = scmp.lt.u32.totalorder %s891_s11, %s1166_s2 }
   0xe   : > { %p893_p8 = pneg %p1055_p6 }
  0x10   : > { %p894_p9 = pnand %p893_p8, %p892_p7 }
  0x12   : > { %p895_p10 = pneg %p894_p9 }
  0x14   : > { %p900_p12 = pnand %p898_p11, %p895_p10 }
  0x16   : > { %903 = shalt.err (!%p900_p12)
}
  0x17   : > { %s904_s16 = scalar_lea.vmem %s214_s29, 4096  ;;  %p912_p2 = scmp.lt.s32.totalorder %s214_s29, %s214_s29 }
  0x18   : > { %p905_p13 = scmp.ne.s32.totalorder %s214_s29, %s904_s16  ;;  %p913_p5 = scmp.lt.s32.totalorder %s904_s16, %s904_s16 }
  0x1a   : > { %p907_p0 = pnand %p905_p13, %p893_p8  ;;  %p914_p4 = por %p913_p5, %p912_p2 }
  0x1c   : > { %p908_p1 = pneg %p907_p0 }
  0x1e   : > { %p915_p3 = pnand %p914_p4, %p908_p1 }
  0x20   : > { %918 = shalt.err (!%p915_p3)
}
  0x21   : > { %s981_s17 = smov 128   ;;  %s982_s18 = smov 8  }
  0x22   : > { %843 = dma.hbm_to_vmem [thread:$0]  (!%p1055_p6), %s1166_s2, 4096, %s214_s29, [#allocation3], %s981_s17, %s981_s17, %s982_s18  }
  0x23   : > { %s919_s7 = scalar_lea.hbm %s1168_s4, 4096 }
  0x24   : > { %p920_p7 = scmp.ne.s32.totalorder %s1168_s4, %s919_s7  ;;  %p926_p9 = scmp.lt.u32.totalorder %s919_s7, %s1168_s4 }
  0x26   : > { %p922_p3 = pnand %p920_p7, %p893_p8 }
  0x28   : > { %p923_p4 = pneg %p922_p3 }
  0x2a   : > { %p928_p10 = pnand %p926_p9, %p923_p4 }
  0x2c   : > { %931 = shalt.err (!%p928_p10)
}
  0x2d   : > { %s932_s29 = scalar_lea.vmem %s1059_s8, 4096  ;;  %p940_p0 = scmp.lt.s32.totalorder %s1059_s8, %s1059_s8 }
  0x2e   : > { %p933_p11 = scmp.ne.s32.totalorder %s1059_s8, %s932_s29  ;;  %p941_p1 = scmp.lt.s32.totalorder %s932_s29, %s932_s29 }
  0x30   : > { %p935_p12 = pnand %p933_p11, %p893_p8  ;;  %p942_p2 = por %p941_p1, %p940_p0 }
  0x32   : > { %p936_p13 = pneg %p935_p12 }
  0x34   : > { %p943_p5 = pnand %p942_p2, %p936_p13 }
  0x36   : > { %946 = shalt.err (!%p943_p5)
}
  0x37   : > { %s983_s13 = smov 256   ;;  %s984_s14 = smov 16  }
  0x38   : > { %846 = dma.hbm_to_vmem [thread:$0]  (!%p1055_p6), %s1168_s4, 4096, %s1059_s8, [#allocation5], %s983_s13, %s983_s13, %s984_s14  }
  0x39   : > { %p1177_p7 = scmp.ne.s32.totalorder %s1174_s26, 0 }
  0x3a   : > { %p1178_p8 = scmp.ne.s32.totalorder (!%p1177_p7), %s1175_s27, 0 }
  0x3b   : > { %266 = sbr.rel (%p1177_p7) target bundleno = 571 (0x23b), region = 44 }
  0x42   : > { %960 = dma.done.wait (%p1178_p8), [#allocation3], 4096  }
  0x43   : > { %962 = vsyncadd (%p1178_p8), [#allocation3], 4294963200 }
  0x44   : > { %964 = dma.done.wait (%p1178_p8), [#allocation5], 4096  }
  0x45   : > { %966 = vsyncadd (%p1178_p8), [#allocation5], 4294963200  ;;  %p310_p3 = scmp.lt.s32.totalorder %s969_s21, 1  ;;  %v350_v0 = vld [vmem:[#allocation2 + $0x80] sm:$0xff]  ;;  %v351_v1 = vld [vmem:[#allocation2 + $0x88] sm:$0xff]  ;;  %v368_v14 = vlaneseq }
  0x46   : > { %v334_v2 = vld [vmem:[#allocation2] sm:$0xff]  ;;  %v768_v3 = vpack.c.bf16 %v351_v1, %v350_v0  ;;  %v335_v4 = vld [vmem:[#allocation2 + $0x8] sm:$0xff]  ;;  %v352_v5 = vld [vmem:[#allocation2 + $0x90] sm:$0xff] }
  0x47   : > { %v353_v6 = vld [vmem:[#allocation2 + $0x98] sm:$0xff]  ;;  %s1184_s21 = smov (!%p310_p3, %s969_s21), 1  ;;  %v770_v7 = vpack.c.bf16 %v335_v4, %v334_v2  ;;  %v336_v9 = vld [vmem:[#allocation2 + $0x10] sm:$0xff]  ;;  %v354_v11 = vld [vmem:[#allocation2 + $0xa0] sm:$0xff]  ;;  %v1131_v21 = vshrl.u32 %v368_v14, 7  ;;  %vm596_vm0 = vcmp.lt.s32.totalorder %v368_v14, 256 }
  0x48   : > { %v772_v8 = vpack.c.bf16 %v353_v6, %v352_v5  ;;  %v337_v10 = vld [vmem:[#allocation2 + $0x18] sm:$0xff]  ;;  %769 = vmatprep.subr.bf16.mxu0 %v768_v3  ;;  %v355_v12 = vld [vmem:[#allocation2 + $0xa8] sm:$0xff]  ;;  %v338_v16 = vld [vmem:[#allocation2 + $0x20] sm:$0xff]  ;;  %s1120_s26 = sshll.u32 %s1184_s21, 1 }
  0x49   : > { %771 = vmatpush3.bf16.msra.mxu0 %v770_v7  ;;  %v774_v13 = vpack.c.bf16 %v337_v10, %v336_v9  ;;  %v776_v15 = vpack.c.bf16 %v355_v12, %v354_v11  ;;  %v339_v17 = vld [vmem:[#allocation2 + $0x28] sm:$0xff]  ;;  %v356_v18 = vld [vmem:[#allocation2 + $0xb0] sm:$0xff]  ;;  %v357_v19 = vld [vmem:[#allocation2 + $0xb8] sm:$0xff]  ;;  %s321_s8 = scalar_lea.vmem %s1165_s1, %s1120_s26  ;;  %s317_s19 = scalar_lea.vmem %s1164_s0, %s1120_s26  ;;  %v374_v36 = vsub.s32 1, %v1131_v21 }
  0x4a   : > { %773 = vmatprep.subr.bf16.mxu0 %v772_v8  ;;  %v778_v20 = vpack.c.bf16 %v339_v17, %v338_v16  ;;  %v780_v22 = vpack.c.bf16 %v357_v19, %v356_v18  ;;  %v340_v23 = vld [vmem:[#allocation2 + $0x30] sm:$0xff]  ;;  %v341_v24 = vld [vmem:[#allocation2 + $0x38] sm:$0xff]  ;;  %v358_v25 = vld [vmem:[#allocation2 + $0xc0] sm:$0xff]  ;;  %s329_s10 = scalar_lea.vmem %s1170_s6, %s1120_s26 }
  0x4b   : > { %v359_v26 = vld [vmem:[#allocation2 + $0xc8] sm:$0xff]  ;;  %v330_v27 = vld [vmem:[%s321_s8] sm:$0x3]  ;;  %v452_v32 = vld [vmem:[#allocation4 + $0x18] sm:$0xff]  ;;  %v782_v33 = vpack.c.bf16 %v341_v24, %v340_v23  ;;  %v370_v24 = vsub.s32 0, %v1131_v21 }
  0x4c   : > { %v342_v28 = vld [vmem:[#allocation2 + $0x40] sm:$0xff]  ;;  %v343_v29 = vld [vmem:[#allocation2 + $0x48] sm:$0xff]  ;;  %v360_v34 = vld [vmem:[#allocation2 + $0xd0] sm:$0xff]  ;;  %v784_v41 = vpack.c.bf16 %v359_v26, %v358_v25 }
  0x4d   : > { %775 = vmatpush3.bf16.msra.mxu0 %v774_v13  ;;  %v331_v30 = vld [vmem:[%s317_s19] sm:$0x3]  ;;  %v450_v31 = vld [vmem:[#allocation4 + $0x8] sm:$0xff]  ;;  %v451_v39 = vld [vmem:[#allocation4 + $0x10] sm:$0xff]  ;;  %v786_v52 = vpack.c.bf16 %v343_v29, %v342_v28 }
  0x4e   : > { %777 = vmatprep.subr.bf16.mxu0 %v776_v15  ;;  %v332_v35 = vmul.f32 0.8, %v331_v30  ;;  %v800_v37 = vpack.c.bf16 %v452_v32, %v450_v31  ;;  %v449_v38 = vld [vmem:[#allocation4] sm:$0xff]  ;;  %v454_v40 = vld [vmem:[#allocation4 + $0x28] sm:$0xff]  ;;  %v456_v43 = vld [vmem:[#allocation4 + $0x38] sm:$0xff] }
  0x4f   : > { %v802_v42 = vpack.c.bf16 %v451_v39, %v449_v38  ;;  %v453_v44 = vld [vmem:[#allocation4 + $0x20] sm:$0xff]  ;;  %v455_v45 = vld [vmem:[#allocation4 + $0x30] sm:$0xff]  ;;  %v361_v46 = vld [vmem:[#allocation2 + $0xd8] sm:$0xff]  ;;  %v804_v48 = vpack.c.bf16 %v456_v43, %v454_v40 }
  0x50   : > { %v1134_v47 = vadd.f32 %v332_v35, %v330_v27  ;;  %801 = vmatprep.subr.bf16.mxu1 %v800_v37  ;;  %v458_v49 = vld [vmem:[#allocation4 + $0x48] sm:$0xff]  ;;  %v460_v50 = vld [vmem:[#allocation4 + $0x58] sm:$0xff]  ;;  %v806_v51 = vpack.c.bf16 %v455_v45, %v453_v44  ;;  %v344_v53 = vld [vmem:[#allocation2 + $0x50] sm:$0xff]  ;;  %v788_v58 = vpack.c.bf16 %v361_v46, %v360_v34  ;;  %v985_v45 = vmov 0.0  }
  0x51   : > { %779 = vmatpush3.bf16.msra.mxu0 %v778_v20  ;;  %803 = vmatpush1.bf16.msra.mxu1 %v802_v42  ;;  %v808_v55 = vpack.c.bf16 %v460_v50, %v458_v49  ;;  %v457_v56 = vld [vmem:[#allocation4 + $0x40] sm:$0xff]  ;;  %v459_v57 = vld [vmem:[#allocation4 + $0x50] sm:$0xff]  ;;  %v345_v59 = vld [vmem:[#allocation2 + $0x58] sm:$0xff] }
  0x52   : > { %781 = vmatprep.subr.bf16.mxu0 %v780_v22  ;;  %v375_v54 = vrot.slane %v1134_v47, %v374_v36  ;;  %805 = vmatprep.subr.bf16.mxu1 %v804_v48  ;;  %v462_v60 = vld [vmem:[#allocation4 + $0x68] sm:$0xff]  ;;  %v464_v61 = vld [vmem:[#allocation4 + $0x78] sm:$0xff]  ;;  %v362_v62 = vld [vmem:[#allocation2 + $0xe0] sm:$0xff]  ;;  %v810_v0 = vpack.c.bf16 %v459_v57, %v457_v56  ;;  %v790_v1 = vpack.c.bf16 %v345_v59, %v344_v53 }
  0x53   : > { %v363_v63 = vld [vmem:[#allocation2 + $0xe8] sm:$0xff]  ;;  %v346_v2 = vld [vmem:[#allocation2 + $0x60] sm:$0xff]  ;;  %v812_v3 = vpack.c.bf16 %v464_v61, %v462_v60  ;;  %v463_v5 = vld [vmem:[#allocation4 + $0x70] sm:$0xff]  ;;  %v371_v30 = vrot.slane %v1134_v47, %v370_v24  ;;  %557 = vmatprep.mubr.f32.mxu1 %v985_v45 }
  0x54   : > { %442 = vmatprep.mubr.f32.mxu0 %v375_v54  ;;  %v461_v4 = vld [vmem:[#allocation4 + $0x60] sm:$0xff]  ;;  %v792_v6 = vpack.c.bf16 %v363_v63, %v362_v62  ;;  %v347_v7 = vld [vmem:[#allocation2 + $0x68] sm:$0xff]  ;;  %v468_v9 = vld [vmem:[#allocation4 + $0x98] sm:$0xff] }
  0x55   : > { %783 = vmatpush3.bf16.msra.mxu0 %v782_v33  ;;  %807 = vmatpush1.bf16.msra.mxu1 %v806_v51  ;;  %v466_v8 = vld [vmem:[#allocation4 + $0x88] sm:$0xff]  ;;  %v364_v10 = vld [vmem:[#allocation2 + $0xf0] sm:$0xff]  ;;  %v365_v11 = vld [vmem:[#allocation2 + $0xf8] sm:$0xff]  ;;  %v814_v12 = vpack.c.bf16 %v463_v5, %v461_v4  ;;  %v794_v13 = vpack.c.bf16 %v347_v7, %v346_v2 }
  0x56   : > { %785 = vmatprep.subr.bf16.mxu0 %v784_v41  ;;  %809 = vmatprep.subr.bf16.mxu1 %v808_v55  ;;  %v348_v15 = vld [vmem:[#allocation2 + $0x70] sm:$0xff]  ;;  %v816_v16 = vpack.c.bf16 %v468_v9, %v466_v8  ;;  %v465_v17 = vld [vmem:[#allocation4 + $0x80] sm:$0xff]  ;;  %v796_v19 = vpack.c.bf16 %v365_v11, %v364_v10  ;;  %v349_v20 = vld [vmem:[#allocation2 + $0x78] sm:$0xff] }
  0x57   : > { %v467_v18 = vld [vmem:[#allocation4 + $0x90] sm:$0xff]  ;;  %v470_v22 = vld [vmem:[#allocation4 + $0xa8] sm:$0xff]  ;;  %v472_v23 = vld [vmem:[#allocation4 + $0xb8] sm:$0xff]  ;;  %v798_v26 = vpack.c.bf16 %v349_v20, %v348_v15 }
  0x58   : > { %v818_v25 = vpack.c.bf16 %v467_v18, %v465_v17  ;;  %v820_v27 = vpack.c.bf16 %v472_v23, %v470_v22  ;;  %v469_v28 = vld [vmem:[#allocation4 + $0xa0] sm:$0xff]  ;;  %v471_v29 = vld [vmem:[#allocation4 + $0xb0] sm:$0xff]  ;;  %v474_v32 = vld [vmem:[#allocation4 + $0xc8] sm:$0xff] }
  0x59   : > { %787 = vmatpush3.bf16.msra.mxu0 %v786_v52  ;;  %811 = vmatpush1.bf16.msra.mxu1 %v810_v0  ;;  %v822_v31 = vpack.c.bf16 %v471_v29, %v469_v28  ;;  %v476_v33 = vld [vmem:[#allocation4 + $0xd8] sm:$0xff]  ;;  %v473_v35 = vld [vmem:[#allocation4 + $0xc0] sm:$0xff]  ;;  %v475_v37 = vld [vmem:[#allocation4 + $0xd0] sm:$0xff] }
  0x5a   : > { %789 = vmatprep.subr.bf16.mxu0 %v788_v58  ;;  %813 = vmatprep.subr.bf16.mxu1 %v812_v3  ;;  %v824_v34 = vpack.c.bf16 %v476_v33, %v474_v32  ;;  %v826_v38 = vpack.c.bf16 %v475_v37, %v473_v35  ;;  %v478_v39 = vld [vmem:[#allocation4 + $0xe8] sm:$0xff]  ;;  %v480_v40 = vld [vmem:[#allocation4 + $0xf8] sm:$0xff]  ;;  %v477_v42 = vld [vmem:[#allocation4 + $0xe0] sm:$0xff] }
  0x5b   : > { %v828_v41 = vpack.c.bf16 %v480_v40, %v478_v39  ;;  %v479_v43 = vld [vmem:[#allocation4 + $0xf0] sm:$0xff]  ;;  %v366_v47 = vld [vmem:[%s1167_s3] sm:$0x1] }
  0x5c   : > { %v830_v44 = vpack.c.bf16 %v479_v43, %v477_v42  ;;  %v481_v52 = vld [vmem:[%s1169_s5] sm:$0x3] }
  0x5d   : > { %791 = vmatpush3.bf16.msra.mxu0 %v790_v1  ;;  %815 = vmatpush1.bf16.msra.mxu1 %v814_v12  ;;  %v486_v53 = vrot.slane %v481_v52, %v370_v24  ;;  %v490_v54 = vrot.slane %v481_v52, %v374_v36  ;;  %v986_v1 = vmov 1966171168  }
  0x5e   : > { %793 = vmatprep.subr.bf16.mxu0 %v792_v6  ;;  %817 = vmatprep.subr.bf16.mxu1 %v816_v16  ;;  %v580_v2 = vunpack.c.l.s4 %v986_v1 }
  0x60   : > { %v581_v3 = vunpack.c.0.s8 %v580_v2 }
  0x61   : > { %795 = vmatpush3.bf16.msra.mxu0 %v794_v13  ;;  %819 = vmatpush1.bf16.msra.mxu1 %v818_v25 }
  0x62   : > { %797 = vmatprep.subr.bf16.mxu0 %v796_v19  ;;  %821 = vmatprep.subr.bf16.mxu1 %v820_v27  ;;  %v584_v36 = vsub.s32 %v581_v3, %v1131_v21 }
  0x65   : > { %799 = vmatpush3.bf16.msra.mxu0 %v798_v26  ;;  %823 = vmatpush1.bf16.msra.mxu1 %v822_v31 }
  0x66   : > { %825 = vmatprep.subr.bf16.mxu1 %v824_v34 }
  0x68   : > { %443 = vmatmul.mubr.f32.vlgmr.msra.gmra.mrb[0].mxu0 %v371_v30 }
  0x69   : > { %827 = vmatpush1.bf16.msra.mxu1 %v826_v38 }
  0x6a   : > { %829 = vmatprep.subr.bf16.mxu1 %v828_v41 }
  0x6d   : > { %831 = vmatpush1.bf16.msra.mxu1 %v830_v44 }
 0x13b   : > { %v765_v46 = vpop.f32.mrb[0].mxu0 }
 0x13c   : > { %v766_v48 = vpop.f32.mrb[1].mxu0 }
 0x13d   : > { %v767_v49 = vadd.f32 %v766_v48, %v765_v46 }
 0x13f   : > { %v445_v50 = vadd.f32 %v767_v49, %v366_v47 }
 0x141   : > { %v448_v51 = vmax.f32 %v445_v50, 0.0 }
 0x143   : > { %558 = vmatmul.mubr.f32.vlgmr.msra.gmra.mrb[0].mxu1 %v448_v51 }
 0x216   : > { %v559_v55 = vpop.f32.mrb[0].mxu1 }
 0x217   : > { %v560_v56 = vadd.f32 %v559_v55, %v486_v53  ;;  %v561_v57 = vpop.f32.mrb[1].mxu1 }
 0x218   : > { %v562_v58 = vadd.f32 %v561_v57, %v490_v54 }
 0x219   : > { %v729_v59 = vmul.f32 -1.442695, %v560_v56 }
 0x21a   : > { %v730_v60 = vmul.f32 -1.442695, %v562_v58 }
 0x21b   : > { %883 = vpow2.f32 %v729_v59 }
 0x21c   : > { %885 = vpow2.f32 %v730_v60 }
 0x225   : > { %v884_v61 = vpop.eup %883 }
 0x226   : > { %v886_v62 = vpop.eup %885  ;;  %v570_v63 = vadd.f32 1.0, %v884_v61 }
 0x227   : > { %v571_v0 = vadd.f32 1.0, %v886_v62 }
 0x228   : > { %887 = vrcp.f32 %v570_v63 }
 0x229   : > { %889 = vrcp.f32 %v571_v0 }
 0x232   : > { %v888_v4 = vpop.eup %887 }
 0x233   : > { %v890_v5 = vpop.eup %889 }
 0x234   : > { %v578_v6 = vcombine.low %v888_v4, %v890_v5 }
 0x236   : > { %v585_v7 = vrot.slane %v578_v6, %v584_v36 }
 0x238   : > { %v592_v8 = vrot.slane %v585_v7, %v584_v36 }
 0x23a   : > { %598 = vst.msk [vmem:[%s329_s10] sm:$0x3] %vm596_vm0, %v592_v8 }
 0x23b PF: > { %s18_s23 = sadd.s32 1, %s977_s23   ;;  %s1179_s21 = smov %s973_s22 }
 0x23c   : > { %p15_p6 = scmp.ge.s32.totalorder %s18_s23, 4   ;;  %s1180_s22 = smov %s1182_s25 }
 0x23e   :  { %17 = sbr.rel (!%p15_p6) target bundleno = 3 (0x3), region = 86 }
 0x245   :  { %626 = vsyncpa [#allocation3], 1 }
 0x246   :  { %628 = vsyncpa [#allocation3 + $0x1], 1 }
 0x247   :  { %629 = vsyncpa [#allocation5], 1 }

</bundles_post_ra>
